<compile_context>
chip_gen: v5e
topology: v5e:2x2
jax: 0.10.0
libtpu: 0.0.40
codegen_flags: <defaults>
</compile_context>

<pallas_src>
import functools

import jax
import jax.numpy as jnp
from jax.experimental import pallas as pl
from jax.experimental.pallas import tpu as pltpu


def _ceil_to(x, m):
    return ((x + m - 1) // m) * m


def _gated_fusion_kernel(*refs, n, o_pad):
    # refs layout:  x_0..x_{n-1}, w_0..w_{n-1}, b_0..b_{n-1}, o_ref
    #   x_i: (TB, D_i)      embedding tile (native dtype, cast to w dtype here)
    #   w_i: (D_i, 2*Opad)  [Wp | Wg] fused along the output axis (bf16)
    #   b_i: (1,   2*Opad)  [bp | bg] (f32)
    #   o  : (TB, Opad)     f32 output tile; doubles as the accumulator.
    x_refs = refs[:n]
    w_refs = refs[n:2 * n]
    b_refs = refs[2 * n:3 * n]
    o_ref = refs[3 * n]

    for i in range(n):  # small static N -> unrolled; one MXU matmul per embedding
        w = w_refs[i][...]
        x = x_refs[i][...].astype(w.dtype)                 # bf16 into the MXU
        y = jnp.dot(x, w, preferred_element_type=jnp.float32) + b_refs[i][...]
        proj = y[:, :o_pad]                                # lane-aligned 128 slices
        gate = jax.nn.sigmoid(y[:, o_pad:])                # f32 VPU/EUP math
        contrib = gate * proj
        if i == 0:
            o_ref[...] = contrib                           # VMEM-resident accumulator
        else:
            o_ref[...] += contrib


def prepare_gated_fusion_params(proj_ws, proj_bs, gate_ws, gate_bs,
                                output_dim, input_dims,
                                param_dtype=jnp.bfloat16):
    """One-time (init) prep: transpose, O-pad to 128, fuse [Wp|Wg], cast to bf16."""
    n = len(proj_ws)
    o = output_dim
    o_pad = max(_ceil_to(o, 128), 128)

    ws, bs = [], []
    for wp, bp, wg, bg in zip(proj_ws, proj_bs, gate_ws, gate_bs):
        d = wp.shape[1]
        w = jnp.zeros((d, 2 * o_pad), jnp.float32)
        w = w.at[:, :o].set(wp.T.astype(jnp.float32))
        w = w.at[:, o_pad:o_pad + o].set(wg.T.astype(jnp.float32))
        ws.append(w.astype(param_dtype))                   # [D_i, 2*Opad]
        b = jnp.zeros((1, 2 * o_pad), jnp.float32)
        b = b.at[0, :o].set(bp.astype(jnp.float32))
        b = b.at[0, o_pad:o_pad + o].set(bg.astype(jnp.float32))
        bs.append(b)                                       # [1, 2*Opad], f32
    return dict(ws=ws, bs=bs, n=n, o=o, o_pad=o_pad, input_dims=list(input_dims))


def gated_fusion_apply(params, embeddings, *, tile_b=256):
    """Hot path: one pallas_call, grid over batch tiles, resident weights."""
    n = params["n"]
    if n == 0:
        # Matches the PyTorch fallback `torch.zeros(1)` when there are no inputs.
        return jnp.zeros((1,), jnp.float32)

    o, o_pad = params["o"], params["o_pad"]
    dims = params["input_dims"]
    ws, bs = params["ws"], params["bs"]

    B = embeddings[0].shape[0]
    tb = min(tile_b, _ceil_to(B, 8))
    b_pad = _ceil_to(B, tb)
    xs = list(embeddings)
    if b_pad != B:
        # Only pads the (rare) ragged batch tail; no Dmax padding, no stacking.
        xs = [jnp.pad(x, ((0, b_pad - B), (0, 0))) for x in xs]
    grid = (b_pad // tb,)

    in_specs = (
        [pl.BlockSpec((tb, d), lambda i: (i, 0)) for d in dims]
        + [pl.BlockSpec((d, 2 * o_pad), lambda i: (0, 0)) for d in dims]   # resident
        + [pl.BlockSpec((1, 2 * o_pad), lambda i: (0, 0)) for _ in dims]   # resident
    )
    out_spec = pl.BlockSpec((tb, o_pad), lambda i: (i, 0))

    # Cost hint for the XLA scheduler around the custom call.
    x_bytes = sum(b_pad * d * x.dtype.itemsize for d, x in zip(dims, xs))
    w_bytes = sum(int(w.size) * w.dtype.itemsize for w in ws)
    b_bytes = sum(int(b.size) * b.dtype.itemsize for b in bs)
    out_bytes = b_pad * o_pad * 4
    cost = pl.CostEstimate(
        flops=sum(2 * b_pad * d * 2 * o_pad for d in dims) + 3 * n * b_pad * o_pad,
        transcendentals=n * b_pad * o_pad,
        bytes_accessed=x_bytes + w_bytes + b_bytes + out_bytes,
    )

    # VMEM budget: resident weights/biases + double-buffered x / out tiles.
    resident = w_bytes + b_bytes
    x_tile_bytes = 2 * sum(tb * d * x.dtype.itemsize for d, x in zip(dims, xs))
    out_tile_bytes = 2 * tb * o_pad * 4
    vmem_limit = int(min(max(resident + x_tile_bytes + out_tile_bytes + (4 << 20),
                             16 << 20), 64 << 20))

    kernel = functools.partial(_gated_fusion_kernel, n=n, o_pad=o_pad)
    out = pl.pallas_call(
        kernel,
        grid=grid,
        out_shape=jax.ShapeDtypeStruct((b_pad, o_pad), jnp.float32),
        in_specs=in_specs,
        out_specs=out_spec,
        compiler_params=pltpu.CompilerParams(
            dimension_semantics=("parallel",),      # megacore sharding on v7x
            vmem_limit_bytes=vmem_limit),
        cost_estimate=cost,
    )(*(xs + ws + bs))
    return out[:B, :o]


def gated_fusion_ref(embeddings, proj_ws, proj_bs, gate_ws, gate_bs,
                     compute_dtype=jnp.float32):
    """Pure-JAX reference; compute_dtype mimics the kernel's MXU input quantization."""
    out = None
    for e, wp, bp, wg, bg in zip(embeddings, proj_ws, proj_bs, gate_ws, gate_bs):
        ec = e.astype(compute_dtype).astype(jnp.float32)
        wpc = wp.astype(compute_dtype).astype(jnp.float32)
        wgc = wg.astype(compute_dtype).astype(jnp.float32)
        p = ec @ wpc.T + bp
        g = jax.nn.sigmoid(ec @ wgc.T + bg)
        contrib = g * p
        out = contrib if out is None else out + contrib
    return out


if __name__ == "__main__":
    key = jax.random.PRNGKey(0)
    input_dims = [32, 16, 24]
    output_dim = 32
    B = 8

    keys = jax.random.split(key, 4 * len(input_dims) + 1)
    embeddings, proj_ws, proj_bs, gate_ws, gate_bs = [], [], [], [], []
    ki = 0
    for d in input_dims:
        embeddings.append(jax.random.normal(keys[ki], (B, d), jnp.float32)); ki += 1
        proj_ws.append(0.1 * jax.random.normal(keys[ki], (output_dim, d), jnp.float32)); ki += 1
        proj_bs.append(0.01 * jnp.arange(output_dim, dtype=jnp.float32))
        gate_ws.append(0.1 * jax.random.normal(keys[ki], (output_dim, d), jnp.float32)); ki += 1
        gate_bs.append(0.02 * jnp.arange(output_dim, dtype=jnp.float32))
        ki += 1

    # Default (bf16 weights / bf16 MXU inputs, f32 accumulation).
    params = prepare_gated_fusion_params(
        proj_ws, proj_bs, gate_ws, gate_bs, output_dim, input_dims)
    out = jax.block_until_ready(gated_fusion_apply(params, embeddings))
    assert out.shape == (B, output_dim), out.shape
    ref_q = gated_fusion_ref(embeddings, proj_ws, proj_bs, gate_ws, gate_bs,
                             compute_dtype=jnp.bfloat16)
    ref_f32 = gated_fusion_ref(embeddings, proj_ws, proj_bs, gate_ws, gate_bs)
    assert jnp.allclose(out, ref_q, atol=2e-3, rtol=2e-3), "mismatch vs bf16-quantized ref"
    assert jnp.allclose(out, ref_f32, atol=5e-2, rtol=5e-2), "mismatch vs f32 ref (loose)"

    # Full-precision parameter path (exact check).
    params_f32 = prepare_gated_fusion_params(
        proj_ws, proj_bs, gate_ws, gate_bs, output_dim, input_dims,
        param_dtype=jnp.float32)
    out_f32 = jax.block_until_ready(gated_fusion_apply(params_f32, embeddings))
    assert jnp.allclose(out_f32, ref_f32, atol=1e-4, rtol=1e-4), "mismatch vs f32 ref"

    print("KERNEL_OK")
</pallas_src>

<mosaic_0001>
module attributes {stable_mosaic.version = 11 : i64} {
  func.func @_gated_fusion_kernel(%arg0: i32, %arg1: memref<8x32xf32, #tpu.memory_space<vmem>>, %arg2: memref<8x16xf32, #tpu.memory_space<vmem>>, %arg3: memref<8x24xf32, #tpu.memory_space<vmem>>, %arg4: memref<32x256xbf16, #tpu.memory_space<vmem>>, %arg5: memref<16x256xbf16, #tpu.memory_space<vmem>>, %arg6: memref<24x256xbf16, #tpu.memory_space<vmem>>, %arg7: memref<1x256xf32, #tpu.memory_space<vmem>>, %arg8: memref<1x256xf32, #tpu.memory_space<vmem>>, %arg9: memref<1x256xf32, #tpu.memory_space<vmem>>, %arg10: memref<8x128xf32, #tpu.memory_space<vmem>>) attributes {dimension_semantics = [#tpu.dimension_semantics<parallel>], iteration_bounds = array<i64: 1>, scalar_prefetch = 0 : i64, scratch_operands = 0 : i64, tpu.core_type = #tpu.core_type<tc>, window_params = [{transform_indices = @transform_0, window_bounds = array<i64: 8, 32>}, {transform_indices = @transform_1, window_bounds = array<i64: 8, 16>}, {transform_indices = @transform_2, window_bounds = array<i64: 8, 24>}, {pipeline_mode = #tpu.pipeline_mode<synchronous>, transform_indices = @transform_3, window_bounds = array<i64: 32, 256>}, {pipeline_mode = #tpu.pipeline_mode<synchronous>, transform_indices = @transform_4, window_bounds = array<i64: 16, 256>}, {pipeline_mode = #tpu.pipeline_mode<synchronous>, transform_indices = @transform_5, window_bounds = array<i64: 24, 256>}, {pipeline_mode = #tpu.pipeline_mode<synchronous>, transform_indices = @transform_6, window_bounds = array<i64: 1, 256>}, {pipeline_mode = #tpu.pipeline_mode<synchronous>, transform_indices = @transform_7, window_bounds = array<i64: 1, 256>}, {pipeline_mode = #tpu.pipeline_mode<synchronous>, transform_indices = @transform_8, window_bounds = array<i64: 1, 256>}, {transform_indices = @transform_9, window_bounds = array<i64: 8, 128>}]} {
    %c0 = arith.constant 0 : index
    %c0_0 = arith.constant 0 : index
    %0 = vector.load %arg4[%c0, %c0_0] : memref<32x256xbf16, #tpu.memory_space<vmem>>, vector<32x256xbf16>
    %c0_1 = arith.constant 0 : index
    %c0_2 = arith.constant 0 : index
    %1 = vector.load %arg1[%c0_1, %c0_2] : memref<8x32xf32, #tpu.memory_space<vmem>>, vector<8x32xf32>
    %2 = arith.truncf %1 : vector<8x32xf32> to vector<8x32xbf16>
    %cst = arith.constant dense<0.000000e+00> : vector<8x256xf32>
    %3 = tpu.matmul %2, %0, %cst {dimension_numbers = #tpu.dot_dimension_numbers<[1], [0], [0], [1], [0, 0, 1, 1], [], []>} : vector<8x32xbf16>, vector<32x256xbf16>, vector<8x256xf32> -> vector<8x256xf32>
    %c0_3 = arith.constant 0 : index
    %c0_4 = arith.constant 0 : index
    %4 = vector.load %arg7[%c0_3, %c0_4] : memref<1x256xf32, #tpu.memory_space<vmem>>, vector<1x256xf32>
    %5 = vector.broadcast %4 : vector<1x256xf32> to vector<8x256xf32>
    %6 = arith.addf %3, %5 : vector<8x256xf32>
    %7 = vector.extract_strided_slice %6 {offsets = [0, 0], sizes = [8, 128], strides = [1, 1]} : vector<8x256xf32> to vector<8x128xf32>
    %8 = vector.extract_strided_slice %6 {offsets = [0, 128], sizes = [8, 128], strides = [1, 1]} : vector<8x256xf32> to vector<8x128xf32>
    %9 = arith.negf %8 : vector<8x128xf32>
    %10 = math.exp %9 : vector<8x128xf32>
    %cst_5 = arith.constant 1.000000e+00 : f32
    %11 = vector.broadcast %cst_5 : f32 to vector<8x128xf32>
    %12 = arith.addf %11, %10 : vector<8x128xf32>
    %13 = arith.divf %11, %12 : vector<8x128xf32>
    %14 = arith.mulf %13, %7 : vector<8x128xf32>
    %c0_6 = arith.constant 0 : index
    %c0_7 = arith.constant 0 : index
    %15 = vector.load %arg10[%c0_6, %c0_7] : memref<8x128xf32, #tpu.memory_space<vmem>>, vector<8x128xf32>
    tpu.vector_store %arg10[%c0_6, %c0_7], %14 {strides = array<i32>} : memref<8x128xf32, #tpu.memory_space<vmem>>, vector<8x128xf32>,
    %c0_8 = arith.constant 0 : index
    %c0_9 = arith.constant 0 : index
    %16 = vector.load %arg5[%c0_8, %c0_9] : memref<16x256xbf16, #tpu.memory_space<vmem>>, vector<16x256xbf16>
    %c0_10 = arith.constant 0 : index
    %c0_11 = arith.constant 0 : index
    %17 = vector.load %arg2[%c0_10, %c0_11] : memref<8x16xf32, #tpu.memory_space<vmem>>, vector<8x16xf32>
    %18 = arith.truncf %17 : vector<8x16xf32> to vector<8x16xbf16>
    %cst_12 = arith.constant dense<0.000000e+00> : vector<8x256xf32>
    %19 = tpu.matmul %18, %16, %cst_12 {dimension_numbers = #tpu.dot_dimension_numbers<[1], [0], [0], [1], [0, 0, 1, 1], [], []>} : vector<8x16xbf16>, vector<16x256xbf16>, vector<8x256xf32> -> vector<8x256xf32>
    %c0_13 = arith.constant 0 : index
    %c0_14 = arith.constant 0 : index
    %20 = vector.load %arg8[%c0_13, %c0_14] : memref<1x256xf32, #tpu.memory_space<vmem>>, vector<1x256xf32>
    %21 = vector.broadcast %20 : vector<1x256xf32> to vector<8x256xf32>
    %22 = arith.addf %19, %21 : vector<8x256xf32>
    %23 = vector.extract_strided_slice %22 {offsets = [0, 0], sizes = [8, 128], strides = [1, 1]} : vector<8x256xf32> to vector<8x128xf32>
    %24 = vector.extract_strided_slice %22 {offsets = [0, 128], sizes = [8, 128], strides = [1, 1]} : vector<8x256xf32> to vector<8x128xf32>
    %25 = arith.negf %24 : vector<8x128xf32>
    %26 = math.exp %25 : vector<8x128xf32>
    %cst_15 = arith.constant 1.000000e+00 : f32
    %27 = vector.broadcast %cst_15 : f32 to vector<8x128xf32>
    %28 = arith.addf %27, %26 : vector<8x128xf32>
    %29 = arith.divf %27, %28 : vector<8x128xf32>
    %30 = arith.mulf %29, %23 : vector<8x128xf32>
    %c0_16 = arith.constant 0 : index
    %c0_17 = arith.constant 0 : index
    %31 = vector.load %arg10[%c0_16, %c0_17] : memref<8x128xf32, #tpu.memory_space<vmem>>, vector<8x128xf32>
    %32 = arith.addf %31, %30 : vector<8x128xf32>
    %c0_18 = arith.constant 0 : index
    %c0_19 = arith.constant 0 : index
    %33 = vector.load %arg10[%c0_18, %c0_19] : memref<8x128xf32, #tpu.memory_space<vmem>>, vector<8x128xf32>
    tpu.vector_store %arg10[%c0_18, %c0_19], %32 {strides = array<i32>} : memref<8x128xf32, #tpu.memory_space<vmem>>, vector<8x128xf32>,
    %c0_20 = arith.constant 0 : index
    %c0_21 = arith.constant 0 : index
    %34 = vector.load %arg6[%c0_20, %c0_21] : memref<24x256xbf16, #tpu.memory_space<vmem>>, vector<24x256xbf16>
    %c0_22 = arith.constant 0 : index
    %c0_23 = arith.constant 0 : index
    %35 = vector.load %arg3[%c0_22, %c0_23] : memref<8x24xf32, #tpu.memory_space<vmem>>, vector<8x24xf32>
    %36 = arith.truncf %35 : vector<8x24xf32> to vector<8x24xbf16>
    %cst_24 = arith.constant dense<0.000000e+00> : vector<8x256xf32>
    %37 = tpu.matmul %36, %34, %cst_24 {dimension_numbers = #tpu.dot_dimension_numbers<[1], [0], [0], [1], [0, 0, 1, 1], [], []>} : vector<8x24xbf16>, vector<24x256xbf16>, vector<8x256xf32> -> vector<8x256xf32>
    %c0_25 = arith.constant 0 : index
    %c0_26 = arith.constant 0 : index
    %38 = vector.load %arg9[%c0_25, %c0_26] : memref<1x256xf32, #tpu.memory_space<vmem>>, vector<1x256xf32>
    %39 = vector.broadcast %38 : vector<1x256xf32> to vector<8x256xf32>
    %40 = arith.addf %37, %39 : vector<8x256xf32>
    %41 = vector.extract_strided_slice %40 {offsets = [0, 0], sizes = [8, 128], strides = [1, 1]} : vector<8x256xf32> to vector<8x128xf32>
    %42 = vector.extract_strided_slice %40 {offsets = [0, 128], sizes = [8, 128], strides = [1, 1]} : vector<8x256xf32> to vector<8x128xf32>
    %43 = arith.negf %42 : vector<8x128xf32>
    %44 = math.exp %43 : vector<8x128xf32>
    %cst_27 = arith.constant 1.000000e+00 : f32
    %45 = vector.broadcast %cst_27 : f32 to vector<8x128xf32>
    %46 = arith.addf %45, %44 : vector<8x128xf32>
    %47 = arith.divf %45, %46 : vector<8x128xf32>
    %48 = arith.mulf %47, %41 : vector<8x128xf32>
    %c0_28 = arith.constant 0 : index
    %c0_29 = arith.constant 0 : index
    %49 = vector.load %arg10[%c0_28, %c0_29] : memref<8x128xf32, #tpu.memory_space<vmem>>, vector<8x128xf32>
    %50 = arith.addf %49, %48 : vector<8x128xf32>
    %c0_30 = arith.constant 0 : index
    %c0_31 = arith.constant 0 : index
    %51 = vector.load %arg10[%c0_30, %c0_31] : memref<8x128xf32, #tpu.memory_space<vmem>>, vector<8x128xf32>
    tpu.vector_store %arg10[%c0_30, %c0_31], %50 {strides = array<i32>} : memref<8x128xf32, #tpu.memory_space<vmem>>, vector<8x128xf32>,
    return
  }
  func.func @transform_0(%arg0: i32) -> (i32, i32) {
    %c0_i32 = arith.constant 0 : i32
    %c0_i32_0 = arith.constant 0 : i32
    return %arg0, %c0_i32 : i32, i32
  }
  func.func @transform_1(%arg0: i32) -> (i32, i32) {
    %c0_i32 = arith.constant 0 : i32
    %c0_i32_0 = arith.constant 0 : i32
    return %arg0, %c0_i32 : i32, i32
  }
  func.func @transform_2(%arg0: i32) -> (i32, i32) {
    %c0_i32 = arith.constant 0 : i32
    %c0_i32_0 = arith.constant 0 : i32
    return %arg0, %c0_i32 : i32, i32
  }
  func.func @transform_3(%arg0: i32) -> (i32, i32) {
    %c0_i32 = arith.constant 0 : i32
    %c0_i32_0 = arith.constant 0 : i32
    %c0_i32_1 = arith.constant 0 : i32
    return %c0_i32, %c0_i32_0 : i32, i32
  }
  func.func @transform_4(%arg0: i32) -> (i32, i32) {
    %c0_i32 = arith.constant 0 : i32
    %c0_i32_0 = arith.constant 0 : i32
    %c0_i32_1 = arith.constant 0 : i32
    return %c0_i32, %c0_i32_0 : i32, i32
  }
  func.func @transform_5(%arg0: i32) -> (i32, i32) {
    %c0_i32 = arith.constant 0 : i32
    %c0_i32_0 = arith.constant 0 : i32
    %c0_i32_1 = arith.constant 0 : i32
    return %c0_i32, %c0_i32_0 : i32, i32
  }
  func.func @transform_6(%arg0: i32) -> (i32, i32) {
    %c0_i32 = arith.constant 0 : i32
    %c0_i32_0 = arith.constant 0 : i32
    %c0_i32_1 = arith.constant 0 : i32
    return %c0_i32, %c0_i32_0 : i32, i32
  }
  func.func @transform_7(%arg0: i32) -> (i32, i32) {
    %c0_i32 = arith.constant 0 : i32
    %c0_i32_0 = arith.constant 0 : i32
    %c0_i32_1 = arith.constant 0 : i32
    return %c0_i32, %c0_i32_0 : i32, i32
  }
  func.func @transform_8(%arg0: i32) -> (i32, i32) {
    %c0_i32 = arith.constant 0 : i32
    %c0_i32_0 = arith.constant 0 : i32
    %c0_i32_1 = arith.constant 0 : i32
    return %c0_i32, %c0_i32_0 : i32, i32
  }
  func.func @transform_9(%arg0: i32) -> (i32, i32) {
    %c0_i32 = arith.constant 0 : i32
    %c0_i32_0 = arith.constant 0 : i32
    return %arg0, %c0_i32 : i32, i32
  }
}

</mosaic_0001>

<bundles_post_ra>
// kernel: tpu_custom_call.1
= control target key start
LH: loop header
LB: loop body
LE: loop exit
PB: predicated region body
PF: predicated region fallthrough
CT: control target
= control target key end

     0   :  { %14 = vsyncpa [#allocation3], 0  ;;  %s741_s0 = inlined_call_operand.hbm [shape: f32[8,32], index: 0, kind: input, shape index: {}]   ;;  %s742_s1 = inlined_call_operand.hbm [shape: f32[8,16], index: 1, kind: input, shape index: {}]   ;;  %s743_s2 = inlined_call_operand.hbm [shape: f32[8,24], index: 2, kind: input, shape index: {}]   ;;  %s744_s3 = inlined_call_operand.hbm [shape: bf16[32,256], index: 3, kind: input, shape index: {}]   ;;  %s745_s4 = inlined_call_operand.hbm [shape: bf16[16,256], index: 4, kind: input, shape index: {}]   ;;  %s746_s5 = inlined_call_operand.hbm [shape: bf16[24,256], index: 5, kind: input, shape index: {}]   ;;  %s747_s6 = inlined_call_operand.vmem [shape: f32[1,256], index: 6, kind: input, shape index: {}]   ;;  %s748_s7 = inlined_call_operand.vmem [shape: f32[1,256], index: 7, kind: input, shape index: {}]   ;;  %s749_s8 = inlined_call_operand.vmem [shape: f32[1,256], index: 8, kind: input, shape index: {}]   ;;  %s750_s9 = inlined_call_operand.hbm [shape: f32[8,128], index: 9, kind: output, shape index: {}]  }
   0x1   :  { %15 = vsyncpa [#allocation6], 0 }
   0x2   :  { %16 = vsyncpa [#allocation9], 0 }
   0x3   :  { %17 = vsyncpa [#allocation12], 0  ;;  %s35_s11 = sshll.u32 %s742_s1, 4  ;;  %s36_s11 = int_to_ptr.hbm [resolvable:$true] %s35_s11 }
   0x4   :  { %18 = vsyncpa [#allocation4], 0  ;;  %s632_s12 = smov [#allocation5]   ;;  %s56_s16 = sshll.u32 %s744_s3, 4  ;;  %s57_s16 = int_to_ptr.hbm [resolvable:$true] %s56_s16 }
   0x5   :  { %s37_s13 = sshll.u32 %s632_s12, 4  ;;  %s633_s17 = smov [#allocation8]   ;;  %s38_s13 = int_to_ptr.vmem [resolvable:$true] %s37_s13 }
   0x6   :  { %40 = dma.hbm_to_vmem [thread:$0]  %s36_s11, 128, %s38_s13, [#allocation6]  }
   0x7   :  { %s58_s18 = sshll.u32 %s633_s17, 4  ;;  %s634_s19 = smov 128   ;;  %s59_s18 = int_to_ptr.vmem [resolvable:$true] %s58_s18 }
   0x8   :  { %s635_s20 = smov 8   ;;  %s24_s1 = sshll.u32 %s741_s0, 4  ;;  %s25_s1 = int_to_ptr.hbm [resolvable:$true] %s24_s1 }
   0x9   :  { %64 = dma.hbm_to_vmem [thread:$0]  %s57_s16, 512, %s59_s18, [#allocation9], %s634_s19, %s634_s19, %s635_s20  }
   0xa   :  { %s636_s23 = smov [#allocation2]   ;;  %s46_s3 = sshll.u32 %s743_s2, 4  ;;  %s47_s3 = int_to_ptr.hbm [resolvable:$true] %s46_s3 }
   0xb   :  { %s26_s24 = sshll.u32 %s636_s23, 4  ;;  %s637_s27 = smov [#allocation7]   ;;  %s27_s24 = int_to_ptr.vmem [resolvable:$true] %s26_s24 }
   0xc   :  { %29 = dma.hbm_to_vmem [thread:$0]  %s25_s1, 128, %s27_s24, [#allocation3]  }
   0xd   :  { %s48_s28 = sshll.u32 %s637_s27, 4  ;;  %s69_s10 = sshll.u32 %s745_s4, 4  ;;  %s49_s28 = int_to_ptr.vmem [resolvable:$true] %s48_s28  ;;  %s70_s10 = int_to_ptr.hbm [resolvable:$true] %s69_s10 }
   0xe   :  { %51 = dma.hbm_to_vmem [thread:$0]  %s47_s3, 128, %s49_s28, [#allocation6]  }
   0xf   :  { %s82_s12 = sshll.u32 %s746_s5, 4  ;;  %s638_s13 = smov [#allocation10]   ;;  %s83_s12 = int_to_ptr.hbm [resolvable:$true] %s82_s12 }
  0x10   :  { %s71_s14 = sshll.u32 %s638_s13, 4  ;;  %s639_s2 = smov [#allocation11]   ;;  %s72_s14 = int_to_ptr.vmem [resolvable:$true] %s71_s14 }
  0x11   :  { %77 = dma.hbm_to_vmem [thread:$0]  %s70_s10, 256, %s72_s14, [#allocation9], %s634_s19, %s634_s19, %s635_s20  }
  0x12   :  { %s84_s15 = sshll.u32 %s639_s2, 4  ;;  %s85_s15 = int_to_ptr.vmem [resolvable:$true] %s84_s15 }
  0x13   :  { %90 = dma.hbm_to_vmem [thread:$0]  %s83_s12, 384, %s85_s15, [#allocation12], %s634_s19, %s634_s19, %s635_s20  }
  0x14   :  { %622 = dma.done.wait [#allocation3], 128  }
  0x15   :  { %623 = vsyncadd [#allocation3], 4294967168 }
  0x16   :  { %624 = dma.done.wait [#allocation6], 256  }
  0x17   :  { %625 = vsyncadd [#allocation6], 4294967040 }
  0x18   :  { %626 = dma.done.wait [#allocation9], 768  }
  0x19   :  { %627 = vsyncadd [#allocation9], 4294966528 }
  0x1a   :  { %628 = dma.done.wait [#allocation12], 384  }
  0x1b   :  { %629 = vsyncadd [#allocation12], 4294966912  ;;  %v427_v0 = vld [vmem:[#allocation8 + $0x14] sm:$0xf]  ;;  %v396_v1 = vld [vmem:[#allocation8 + $0x18] sm:$0xf0] }
  0x1c   :  { %v429_v2 = vld [vmem:[#allocation10 + $0x4] sm:$0xf]  ;;  %v399_v3 = vor.u32 %v427_v0, %v396_v1  ;;  %v407_v4 = vld [vmem:[#allocation10 + $0x8] sm:$0xf0]  ;;  %v207_v5 = vld [vmem:[#allocation5] sm:$0xff]  ;;  %vm225_vm0 = vcmask 130048  }
  0x1d   :  { %v280_v6 = vld [vmem:[#allocation11 + $0x10] sm:$0xff]  ;;  %v410_v7 = vor.u32 %v429_v2, %v407_v4  ;;  %v388_v10 = vld [vmem:[#allocation8 + $0x8] sm:$0xf0]  ;;  %v208_v12 = vpack.c.bf16 %v207_v5, %v207_v5  ;;  %vm308_vm1 = vcmask 1043456   ;;  %v394_v16 = vld [vmem:[#allocation8 + $0x10] sm:$0xf] }
  0x1e   :  { %v297_v8 = vunpack.c.h.b16 %v280_v6  ;;  %v425_v9 = vld [vmem:[#allocation8 + $0x4] sm:$0xf]  ;;  %v296_v11 = vunpack.c.l.b16 %v280_v6  ;;  %177 = vmatpush.bf16.msra.mxu1 %v399_v3  ;;  %v126_v14 = vld [vmem:[#allocation2] sm:$0xff]  ;;  %v428_v17 = vld [vmem:[#allocation8 + $0x14] sm:$0xf0]  ;;  %vm154_vm2 = vcmask 261120  }
  0x1f   :  { %v391_v13 = vor.u32 %v425_v9, %v388_v10  ;;  %249 = vmatpush.bf16.msra.mxu3 %v410_v7  ;;  %v405_v18 = vld [vmem:[#allocation10] sm:$0xf]  ;;  %v431_v20 = vld [vmem:[#allocation11 + $0x4] sm:$0xf]  ;;  %v418_v21 = vld [vmem:[#allocation11 + $0x8] sm:$0xf0]  ;;  %v395_v22 = vor.u32 %v428_v17, %v394_v16  ;;  %v127_v25 = vpack.c.bf16 %v126_v14, %v126_v14 }
  0x20   :  { %v301_v15 = vpack.c.b16 %v297_v8, %v297_v8  ;;  %v300_v19 = vpack.c.b16 %v296_v11, %v296_v11  ;;  %v430_v23 = vld [vmem:[#allocation10 + $0x4] sm:$0xf0]  ;;  %v386_v27 = vld [vmem:[#allocation8] sm:$0xf]  ;;  %v416_v30 = vld [vmem:[#allocation11] sm:$0xf]  ;;  %v421_v32 = vor.u32 %v431_v20, %v418_v21 }
  0x21   :  { %v406_v26 = vor.u32 %v430_v23, %v405_v18  ;;  %v426_v28 = vld [vmem:[#allocation8 + $0x4] sm:$0xf0]  ;;  %v432_v31 = vld [vmem:[#allocation11 + $0x4] sm:$0xf0]  ;;  %164 = vmatpush.bf16.msra.mxu0 %v395_v22  ;;  %vm304_vm3 = vcmask 195584   ;;  %s371_s21 = sshll.u32 %s750_s9, 4  ;;  %s372_s21 = int_to_ptr.hbm [resolvable:$true] %s371_s21 }
  0x22   :  { %v313_v24 = vsel %vm308_vm1, %v301_v15, 0  ;;  %412 = vmatmul.msk.bf16.vlgmr.msra.gmra.mxu3 %vm225_vm0, %v208_v12  ;;  %178 = vmatpush.bf16.msra.mxu1 %v391_v13  ;;  %v310_v29 = vsel %vm308_vm1, %v300_v19, 0  ;;  %v387_v33 = vor.u32 %v426_v28, %v386_v27  ;;  %v417_v34 = vor.u32 %v432_v31, %v416_v30  ;;  %v281_v35 = vld [vmem:[#allocation7] sm:$0xff]  ;;  %v718_v37 = vld [vmem:[%s747_s6] sm:$0x3] }
  0x23   :  { %334 = vmatpush.bf16.msrb.mxu3 %v313_v24  ;;  %236 = vmatpush.bf16.msra.mxu2 %v406_v26  ;;  %v282_v36 = vpack.c.bf16 %v281_v35, %v281_v35  ;;  %v131_v38 = vperm.slane %v718_v37, 1  ;;  %v724_v39 = vld [vmem:[%s748_s7] sm:$0x3]  ;;  %v130_v17 = vperm.slane %v718_v37, 0  ;;  %s640_s7 = smov [#allocation13]  }
  0x24   :  { %v212_v41 = vperm.slane %v724_v39, 1  ;;  %v283_v53 = vld [vmem:[%s749_s8] sm:$0x3]  ;;  %v211_v18 = vperm.slane %v724_v39, 0  ;;  %s369_s8 = sshll.u32 %s640_s7, 4  ;;  %s370_s8 = int_to_ptr.vmem [resolvable:$true] %s369_s8 }
  0x25   :  { %401 = vmatmul.msk.bf16.vlgmr.msra.gmra.mxu1 %vm154_vm2, %v127_v25  ;;  %165 = vmatpush.bf16.msra.mxu0 %v387_v33  ;;  %v286_v57 = vperm.slane %v283_v53, 1  ;;  %v285_v26 = vperm.slane %v283_v53, 0 }
  0x26   :  { %411 = vmatmul.msk.bf16.vlgmr.msra.gmra.mxu2 %vm225_vm0, %v208_v12 }
  0x27   :  { %321 = vmatpush.bf16.msrb.mxu2 %v310_v29  ;;  %335 = vmatpush.bf16.msrb.mxu3 %v421_v32 }
  0x28   :  { %400 = vmatmul.msk.bf16.vlgmr.msra.gmra.mxu0 %vm154_vm2, %v127_v25 }
  0x2b   :  { %322 = vmatpush.bf16.msrb.mxu2 %v417_v34 }
  0x32   :  { %423 = vmatmul.msk.bf16.vlgmr.msrb.gmra.mxu3 %vm304_vm3, %v282_v36 }
  0x36   :  { %422 = vmatmul.msk.bf16.vlgmr.msrb.gmra.mxu2 %vm304_vm3, %v282_v36 }
  0xa2   :  { %v180_v40 = vpop.f32.mrf.mxu1 }
  0xa3   :  { %v181_v42 = vadd.f32 %v180_v40, %v131_v38 }
  0xa5   :  { %v402_v43 = vmul.f32 -1.442695, %v181_v42  ;;  %v251_v44 = vpop.f32.mrf.mxu3  ;;  %v167_v47 = vpop.f32.mrf.mxu0 }
  0xa6   :  { %v252_v45 = vadd.f32 %v251_v44, %v212_v41  ;;  %v168_v27 = vadd.f32 %v167_v47, %v130_v17 }
  0xa7   :  { %442 = vpow2.f32 %v402_v43 }
  0xa8   :  { %v413_v46 = vmul.f32 -1.442695, %v252_v45 }
  0xa9   :  { %v238_v49 = vpop.f32.mrf.mxu2 }
  0xaa   :  { %444 = vpow2.f32 %v413_v46  ;;  %v182_v48 = vpop.f32.mrf.mxu1  ;;  %v239_v28 = vadd.f32 %v238_v49, %v211_v18 }
  0xad   :  { %v443_v50 = vpop.eup %442  ;;  %v253_v51 = vpop.f32.mrf.mxu3 }
  0xae   :  { %v187_v52 = vadd.f32 1.0, %v443_v50  ;;  %v169_v55 = vpop.f32.mrf.mxu0 }
  0xb0   :  { %v445_v54 = vpop.eup %444  ;;  %446 = vrcp.f32 %v187_v52  ;;  %vm193_vm4 = vweird.f32 %v187_v52  ;;  %v199_v11 = vand.u32 2147483648, %v187_v52  ;;  %v197_v13 = vand.u32 2147483647, %v187_v52 }
  0xb1   :  { %v258_v56 = vadd.f32 1.0, %v445_v54  ;;  %v240_v58 = vpop.f32.mrf.mxu2 }
  0xb2   :  { %v200_v21 = vor.u32 1.1754944e-38, %v199_v11  ;;  %vm198_vm10 = vcmp.eq.f32.partialorder %v197_v13, 8.507059e+37 }
  0xb3   :  { %448 = vrcp.f32 %v258_v56  ;;  %v270_v16 = vand.u32 2147483648, %v258_v56  ;;  %vm264_vm8 = vweird.f32 %v258_v56  ;;  %v268_v19 = vand.u32 2147483647, %v258_v56 }
  0xb5   :  { %v337_v59 = vpop.f32.mrf.mxu3  ;;  %v271_v25 = vor.u32 1.1754944e-38, %v270_v16  ;;  %vm269_vm11 = vcmp.eq.f32.partialorder %v268_v19, 8.507059e+37 }
  0xb6   :  { %v338_v60 = vadd.f32 %v337_v59, %v286_v57  ;;  %v447_v61 = vpop.eup %446 }
  0xb7   :  { %v189_v0 = vmul.f32 %v447_v61, %v187_v52  ;;  %vm194_vm5 = vweird.f32 %v447_v61 }
  0xb8   :  { %v424_v62 = vmul.f32 -1.442695, %v338_v60  ;;  %vm730_vm7 = vmor %vm193_vm4, %vm194_vm5 }
  0xb9   :  { %v449_v63 = vpop.eup %448  ;;  %v324_v2 = vpop.f32.mrf.mxu2  ;;  %v190_v4 = vsub.f32 1.0, %v189_v0 }
  0xba   :  { %450 = vpow2.f32 %v424_v62  ;;  %v260_v1 = vmul.f32 %v449_v63, %v258_v56  ;;  %vm265_vm6 = vweird.f32 %v449_v63  ;;  %v325_v35 = vadd.f32 %v324_v2, %v285_v26 }
  0xbb   :  { %v191_v8 = vmul.f32 %v447_v61, %v190_v4  ;;  %vm266_vm9 = vmor %vm264_vm8, %vm265_vm6 }
  0xbc   :  { %v261_v5 = vsub.f32 1.0, %v260_v1 }
  0xbd   :  { %v339_v3 = vpop.f32.mrf.mxu3  ;;  %v192_v12 = vadd.f32 %v447_v61, %v191_v8 }
  0xbe   :  { %v262_v9 = vmul.f32 %v449_v63, %v261_v5 }
  0xbf   :  { %v196_v22 = vsel %vm730_vm7, %v447_v61, %v192_v12 }
  0xc0   :  { %v451_v6 = vpop.eup %450  ;;  %v263_v14 = vadd.f32 %v449_v63, %v262_v9  ;;  %v201_v30 = vsel %vm198_vm10, %v200_v21, %v196_v22 }
  0xc1   :  { %v344_v7 = vadd.f32 1.0, %v451_v6  ;;  %v326_v10 = vpop.f32.mrf.mxu2  ;;  %v203_v36 = vmul.f32 %v201_v30, %v168_v27 }
  0xc2   :  { %v267_v23 = vsel %vm266_vm9, %v449_v63, %v263_v14 }
  0xc3   :  { %452 = vrcp.f32 %v344_v7  ;;  %v272_v31 = vsel %vm269_vm11, %v271_v25, %v267_v23  ;;  %v356_v32 = vand.u32 2147483648, %v344_v7  ;;  %v354_v34 = vand.u32 2147483647, %v344_v7 }
  0xc4   :  { %v274_v37 = vmul.f32 %v272_v31, %v239_v28  ;;  %vm350_vm13 = vweird.f32 %v344_v7 }
  0xc5   :  { %v357_v39 = vor.u32 1.1754944e-38, %v356_v32  ;;  %vm355_vm15 = vcmp.eq.f32.partialorder %v354_v34, 8.507059e+37 }
  0xc6   :  { %v276_v42 = vadd.f32 %v274_v37, %v203_v36 }
  0xc9   :  { %v453_v20 = vpop.eup %452 }
  0xca   :  { %v346_v24 = vmul.f32 %v453_v20, %v344_v7  ;;  %vm351_vm12 = vweird.f32 %v453_v20 }
  0xcb   :  { %vm352_vm14 = vmor %vm350_vm13, %vm351_vm12 }
  0xcc   :  { %v347_v29 = vsub.f32 1.0, %v346_v24 }
  0xce   :  { %v348_v33 = vmul.f32 %v453_v20, %v347_v29 }
  0xd0   :  { %v349_v38 = vadd.f32 %v453_v20, %v348_v33 }
  0xd2   :  { %v353_v40 = vsel %vm352_vm14, %v453_v20, %v349_v38 }
  0xd3   :  { %v358_v41 = vsel %vm355_vm15, %v357_v39, %v353_v40 }
  0xd4   :  { %v360_v43 = vmul.f32 %v358_v41, %v325_v35 }
  0xd6   :  { %v362_v44 = vadd.f32 %v360_v43, %v276_v42 }
  0xd8   :  { %363 = vst [vmem:[#allocation13] sm:$0xff] %v362_v44 }
  0xd9   :  { %374 = dma.vmem_to_hbm [thread:$0]  %s370_s8, 128, %s372_s21, [#allocation4]  }
  0xda   :  { %630 = dma.done.wait [#allocation4], 128  }
  0xdb   :  { %631 = vsyncadd [#allocation4], 4294967168 }
  0xdc   :  { %379 = vsyncpa [#allocation3], 1 }
  0xdd   :  { %380 = vsyncpa [#allocation6], 1 }
  0xde   :  { %381 = vsyncpa [#allocation9], 1 }
  0xdf   :  { %382 = vsyncpa [#allocation12], 1 }
  0xe0   :  { %383 = vsyncpa [#allocation4], 1 }

</bundles_post_ra>
